<compile_context>
chip_gen: v5e
topology: v5e:2x2
jax: 0.10.0
libtpu: 0.0.40
codegen_flags: <defaults>
</compile_context>

<pallas_src>
import functools

import jax
import jax.numpy as jnp
from jax import lax
from jax.experimental import pallas as pl
from jax.experimental.pallas import tpu as pltpu


# ----------------------------------------------------------------------------
# Pallas kernel: the entire LSTM recurrence in a single invocation.
# Gate order follows PyTorch nn.LSTM: [i, f, g, o].
# ----------------------------------------------------------------------------
def _lstm_recurrence_kernel(gx_ref, wh_ref, h0_ref, c0_ref,
                            h2s_ref, hn_ref, cn_ref):
    """Full LSTM recurrence.

    gx_ref : (T, B, 4H) precomputed input projection + bias (time-major)
    wh_ref : (H, 4H)    recurrent weight, already transposed (f32 or bf16)
    h0_ref : (B, H)     initial hidden state
    c0_ref : (B, H)     initial cell state
    h2s_ref: (B, T*H)   per-step hidden states, lane-dense slab
    hn_ref : (B, H)     final hidden state
    cn_ref : (B, H)     final cell state
    """
    T = gx_ref.shape[0]
    H = h0_ref.shape[-1]

    wh = wh_ref[...]          # hoisted: loaded once, reused every step
    h = h0_ref[...]
    c = c0_ref[...]

    # T is small and static -> full unroll gives cross-step scheduling
    # visibility.  # TODO(synk): switch to lax.fori_loop for large T.
    for t in range(T):
        # Only the loop-carried (B,H) x (H,4H) matmul is on the serial path.
        gates = gx_ref[t] + jnp.dot(h.astype(wh.dtype), wh,
                                    preferred_element_type=jnp.float32)

        # Whole-vreg activations (4H == 128 lanes): 2 EUP pushes per step.
        sig = jax.nn.sigmoid(gates)
        th = jnp.tanh(gates)
        i_g = sig[:, 0 * H:1 * H]
        f_g = sig[:, 1 * H:2 * H]
        g_g = th[:, 2 * H:3 * H]
        o_g = sig[:, 3 * H:4 * H]

        c = f_g * c + i_g * g_g
        h = o_g * jnp.tanh(c)

        # Static slice store into the lane-dense slab (VMEM); the HBM
        # writeback of the whole slab happens once at kernel exit.
        h2s_ref[:, t * H:(t + 1) * H] = h

    hn_ref[...] = h
    cn_ref[...] = c


# ----------------------------------------------------------------------------
# Wrapper: Pallas equivalent of LSTM2.forward.
# ----------------------------------------------------------------------------
def lstm2_forward(x, ws, h1s, prev2, params, *, matmul_dtype=jnp.float32):
    """x:(B,T,3) ws:(B,T,V) h1s:(B,T,H), prev2=(h0,c0) each (1,B,H).

    Returns (h2s (B,T,H), (h_n (1,B,H), c_n (1,B,H))) matching nn.LSTM
    with batch_first=True, num_layers=1.
    `matmul_dtype=jnp.bfloat16` enables bf16 MXU operands for the recurrent
    matmul (recommended on v6e/v7x); state & accumulation remain f32.
    """
    w_ih, w_hh, b_ih, b_hh = params          # (4H,D), (4H,H), (4H,), (4H,)
    h0, c0 = prev2

    B, T, _ = x.shape
    V = ws.shape[-1]
    H = w_hh.shape[1]

    # Split W_ih by input component -> the concat is never materialized.
    w_x = w_ih[:, :3]                        # (4H, 3)
    w_ws = w_ih[:, 3:3 + V]                  # (4H, V)
    w_h1 = w_ih[:, 3 + V:]                   # (4H, H)

    # Hoist the non-recurrent projection out of the serial recurrence:
    # batched matmuls over all T steps, bias (b_ih + b_hh) folded in,
    # time-major output so the kernel indexes the leading axis.
    bias = b_ih + b_hh                                      # (4H,)
    gates_x = (jnp.einsum('btf,gf->tbg', x, w_x)
               + jnp.einsum('btf,gf->tbg', ws, w_ws)
               + jnp.einsum('btf,gf->tbg', h1s, w_h1)
               + bias).astype(jnp.float32)                  # (T, B, 4H)

    wh_t = jnp.transpose(w_hh).astype(matmul_dtype)         # (H, 4H)
    h0_2d = h0[0].astype(jnp.float32)                       # (B, H)
    c0_2d = c0[0].astype(jnp.float32)                       # (B, H)

    vmem = pl.BlockSpec(memory_space=pltpu.MemorySpace.VMEM)

    h2s_flat, hn, cn = pl.pallas_call(
        _lstm_recurrence_kernel,
        out_shape=(
            jax.ShapeDtypeStruct((B, T * H), jnp.float32),  # lane-dense h2s
            jax.ShapeDtypeStruct((B, H), jnp.float32),      # h_n
            jax.ShapeDtypeStruct((B, H), jnp.float32),      # c_n
        ),
        in_specs=[vmem, vmem, vmem, vmem],
        out_specs=(vmem, vmem, vmem),
    )(gates_x, wh_t, h0_2d, c0_2d)

    h2s = h2s_flat.reshape(B, T, H)          # contiguous reshape, no transpose
    return h2s, (hn[None], cn[None])


# ----------------------------------------------------------------------------
# Pure-JAX reference (same PyTorch LSTM semantics) for a correctness check.
# ----------------------------------------------------------------------------
def lstm2_reference(x, ws, h1s, prev2, params):
    w_ih, w_hh, b_ih, b_hh = params
    h0, c0 = prev2
    lstm_input = jnp.concatenate([x, ws, h1s], axis=-1)     # (B, T, D)
    H = w_hh.shape[1]

    def step(carry, x_t):
        h, c = carry
        gates = x_t @ w_ih.T + b_ih + h @ w_hh.T + b_hh
        i = jax.nn.sigmoid(gates[:, 0 * H:1 * H])
        f = jax.nn.sigmoid(gates[:, 1 * H:2 * H])
        g = jnp.tanh(gates[:, 2 * H:3 * H])
        o = jax.nn.sigmoid(gates[:, 3 * H:4 * H])
        c = f * c + i * g
        h = o * jnp.tanh(c)
        return (h, c), h

    (hn, cn), hs = lax.scan(step, (h0[0], c0[0]),
                            jnp.transpose(lstm_input, (1, 0, 2)))
    return jnp.transpose(hs, (1, 0, 2)), (hn[None], cn[None])


if __name__ == "__main__":
    # Small deterministic problem: B=2, T=8, vocab_len=13, cell_size=32
    B, T, VOCAB, H = 2, 8, 13, 32
    D = 3 + VOCAB + H                                        # LSTM input size = 48

    key = jax.random.PRNGKey(0)
    keys = jax.random.split(key, 9)

    x = jax.random.normal(keys[0], (B, T, 3), jnp.float32)
    ws = jax.random.normal(keys[1], (B, T, VOCAB), jnp.float32)
    h1s = jax.random.normal(keys[2], (B, T, H), jnp.float32)
    h0 = jax.random.normal(keys[3], (1, B, H), jnp.float32)
    c0 = jax.random.normal(keys[4], (1, B, H), jnp.float32)

    # PyTorch-style uniform(-1/sqrt(H), 1/sqrt(H)) init.
    bound = 1.0 / jnp.sqrt(jnp.float32(H))
    w_ih = jax.random.uniform(keys[5], (4 * H, D), jnp.float32, -bound, bound)
    w_hh = jax.random.uniform(keys[6], (4 * H, H), jnp.float32, -bound, bound)
    b_ih = jax.random.uniform(keys[7], (4 * H,), jnp.float32, -bound, bound)
    b_hh = jax.random.uniform(keys[8], (4 * H,), jnp.float32, -bound, bound)
    params = (w_ih, w_hh, b_ih, b_hh)

    # f32 path (default).
    fwd = jax.jit(lstm2_forward)
    h2s, (hn, cn) = fwd(x, ws, h1s, (h0, c0), params)
    jax.block_until_ready((h2s, hn, cn))

    h2s_ref, (hn_ref, cn_ref) = lstm2_reference(x, ws, h1s, (h0, c0), params)
    assert h2s.shape == (B, T, H) and hn.shape == (1, B, H) and cn.shape == (1, B, H)
    assert jnp.allclose(h2s, h2s_ref, atol=2e-3, rtol=2e-3)
    assert jnp.allclose(hn, hn_ref, atol=2e-3, rtol=2e-3)
    assert jnp.allclose(cn, cn_ref, atol=2e-3, rtol=2e-3)

    # bf16 recurrent-matmul variant (preferred operand dtype on v6e/v7x MXUs);
    # state/accumulation stay f32 so drift vs the f32 reference is small.
    fwd_bf16 = jax.jit(functools.partial(lstm2_forward,
                                         matmul_dtype=jnp.bfloat16))
    h2s_b, (hn_b, cn_b) = fwd_bf16(x, ws, h1s, (h0, c0), params)
    jax.block_until_ready((h2s_b, hn_b, cn_b))
    assert jnp.allclose(h2s_b, h2s_ref, atol=1e-1, rtol=1e-1)
    assert jnp.allclose(hn_b, hn_ref, atol=1e-1, rtol=1e-1)
    assert jnp.allclose(cn_b, cn_ref, atol=1e-1, rtol=1e-1)

    print("KERNEL_OK")
</pallas_src>

<mosaic_0001>
module attributes {stable_mosaic.version = 11 : i64} {
  func.func @_lstm_recurrence_kernel(%arg0: memref<8x2x128xf32, #tpu.memory_space<vmem>>, %arg1: memref<32x128xf32, #tpu.memory_space<vmem>>, %arg2: memref<2x32xf32, #tpu.memory_space<vmem>>, %arg3: memref<2x32xf32, #tpu.memory_space<vmem>>, %arg4: memref<2x256xf32, #tpu.memory_space<vmem>>, %arg5: memref<2x32xf32, #tpu.memory_space<vmem>>, %arg6: memref<2x32xf32, #tpu.memory_space<vmem>>) attributes {dimension_semantics = [], scalar_prefetch = 0 : i64, scratch_operands = 0 : i64, tpu.core_type = #tpu.core_type<tc>} {
    %c0 = arith.constant 0 : index
    %c0_0 = arith.constant 0 : index
    %0 = vector.load %arg1[%c0, %c0_0] : memref<32x128xf32, #tpu.memory_space<vmem>>, vector<32x128xf32>
    %c0_1 = arith.constant 0 : index
    %c0_2 = arith.constant 0 : index
    %1 = vector.load %arg2[%c0_1, %c0_2] : memref<2x32xf32, #tpu.memory_space<vmem>>, vector<2x32xf32>
    %c0_3 = arith.constant 0 : index
    %c0_4 = arith.constant 0 : index
    %2 = vector.load %arg3[%c0_3, %c0_4] : memref<2x32xf32, #tpu.memory_space<vmem>>, vector<2x32xf32>
    %c0_5 = arith.constant 0 : index
    %c0_6 = arith.constant 0 : index
    %c0_7 = arith.constant 0 : index
    %3 = vector.load %arg0[%c0_5, %c0_6, %c0_7] : memref<8x2x128xf32, #tpu.memory_space<vmem>>, vector<1x2x128xf32>
    %4 = vector.shape_cast %3 : vector<1x2x128xf32> to vector<2x128xf32>
    %cst = arith.constant dense<0.000000e+00> : vector<2x128xf32>
    %5 = tpu.matmul %1, %0, %cst {dimension_numbers = #tpu.dot_dimension_numbers<[1], [0], [0], [1], [0, 0, 1, 1], [], []>} : vector<2x32xf32>, vector<32x128xf32>, vector<2x128xf32> -> vector<2x128xf32>
    %6 = arith.addf %4, %5 : vector<2x128xf32>
    %7 = arith.negf %6 : vector<2x128xf32>
    %8 = math.exp %7 : vector<2x128xf32>
    %cst_8 = arith.constant 1.000000e+00 : f32
    %9 = vector.broadcast %cst_8 : f32 to vector<2x128xf32>
    %10 = arith.addf %9, %8 : vector<2x128xf32>
    %11 = arith.divf %9, %10 : vector<2x128xf32>
    %12 = math.tanh %6 : vector<2x128xf32>
    %13 = vector.extract_strided_slice %11 {offsets = [0, 0], sizes = [2, 32], strides = [1, 1]} : vector<2x128xf32> to vector<2x32xf32>
    %14 = vector.extract_strided_slice %11 {offsets = [0, 32], sizes = [2, 32], strides = [1, 1]} : vector<2x128xf32> to vector<2x32xf32>
    %15 = vector.extract_strided_slice %12 {offsets = [0, 64], sizes = [2, 32], strides = [1, 1]} : vector<2x128xf32> to vector<2x32xf32>
    %16 = vector.extract_strided_slice %11 {offsets = [0, 96], sizes = [2, 32], strides = [1, 1]} : vector<2x128xf32> to vector<2x32xf32>
    %17 = arith.mulf %14, %2 : vector<2x32xf32>
    %18 = arith.mulf %13, %15 : vector<2x32xf32>
    %19 = arith.addf %17, %18 : vector<2x32xf32>
    %20 = math.tanh %19 : vector<2x32xf32>
    %21 = arith.mulf %16, %20 : vector<2x32xf32>
    %c0_9 = arith.constant 0 : index
    %c0_10 = arith.constant 0 : index
    %22 = vector.load %arg4[%c0_9, %c0_10] : memref<2x256xf32, #tpu.memory_space<vmem>>, vector<2x32xf32>
    tpu.vector_store %arg4[%c0_9, %c0_10], %21 {strides = array<i32>} : memref<2x256xf32, #tpu.memory_space<vmem>>, vector<2x32xf32>,
    %c1 = arith.constant 1 : index
    %c0_11 = arith.constant 0 : index
    %c0_12 = arith.constant 0 : index
    %23 = vector.load %arg0[%c1, %c0_11, %c0_12] : memref<8x2x128xf32, #tpu.memory_space<vmem>>, vector<1x2x128xf32>
    %24 = vector.shape_cast %23 : vector<1x2x128xf32> to vector<2x128xf32>
    %cst_13 = arith.constant dense<0.000000e+00> : vector<2x128xf32>
    %25 = tpu.matmul %21, %0, %cst_13 {dimension_numbers = #tpu.dot_dimension_numbers<[1], [0], [0], [1], [0, 0, 1, 1], [], []>} : vector<2x32xf32>, vector<32x128xf32>, vector<2x128xf32> -> vector<2x128xf32>
    %26 = arith.addf %24, %25 : vector<2x128xf32>
    %27 = arith.negf %26 : vector<2x128xf32>
    %28 = math.exp %27 : vector<2x128xf32>
    %cst_14 = arith.constant 1.000000e+00 : f32
    %29 = vector.broadcast %cst_14 : f32 to vector<2x128xf32>
    %30 = arith.addf %29, %28 : vector<2x128xf32>
    %31 = arith.divf %29, %30 : vector<2x128xf32>
    %32 = math.tanh %26 : vector<2x128xf32>
    %33 = vector.extract_strided_slice %31 {offsets = [0, 0], sizes = [2, 32], strides = [1, 1]} : vector<2x128xf32> to vector<2x32xf32>
    %34 = vector.extract_strided_slice %31 {offsets = [0, 32], sizes = [2, 32], strides = [1, 1]} : vector<2x128xf32> to vector<2x32xf32>
    %35 = vector.extract_strided_slice %32 {offsets = [0, 64], sizes = [2, 32], strides = [1, 1]} : vector<2x128xf32> to vector<2x32xf32>
    %36 = vector.extract_strided_slice %31 {offsets = [0, 96], sizes = [2, 32], strides = [1, 1]} : vector<2x128xf32> to vector<2x32xf32>
    %37 = arith.mulf %34, %19 : vector<2x32xf32>
    %38 = arith.mulf %33, %35 : vector<2x32xf32>
    %39 = arith.addf %37, %38 : vector<2x32xf32>
    %40 = math.tanh %39 : vector<2x32xf32>
    %41 = arith.mulf %36, %40 : vector<2x32xf32>
    %c0_15 = arith.constant 0 : index
    %c32 = arith.constant 32 : index
    %42 = vector.load %arg4[%c0_15, %c32] : memref<2x256xf32, #tpu.memory_space<vmem>>, vector<2x32xf32>
    tpu.vector_store %arg4[%c0_15, %c32], %41 {strides = array<i32>} : memref<2x256xf32, #tpu.memory_space<vmem>>, vector<2x32xf32>,
    %c2 = arith.constant 2 : index
    %c0_16 = arith.constant 0 : index
    %c0_17 = arith.constant 0 : index
    %43 = vector.load %arg0[%c2, %c0_16, %c0_17] : memref<8x2x128xf32, #tpu.memory_space<vmem>>, vector<1x2x128xf32>
    %44 = vector.shape_cast %43 : vector<1x2x128xf32> to vector<2x128xf32>
    %cst_18 = arith.constant dense<0.000000e+00> : vector<2x128xf32>
    %45 = tpu.matmul %41, %0, %cst_18 {dimension_numbers = #tpu.dot_dimension_numbers<[1], [0], [0], [1], [0, 0, 1, 1], [], []>} : vector<2x32xf32>, vector<32x128xf32>, vector<2x128xf32> -> vector<2x128xf32>
    %46 = arith.addf %44, %45 : vector<2x128xf32>
    %47 = arith.negf %46 : vector<2x128xf32>
    %48 = math.exp %47 : vector<2x128xf32>
    %cst_19 = arith.constant 1.000000e+00 : f32
    %49 = vector.broadcast %cst_19 : f32 to vector<2x128xf32>
    %50 = arith.addf %49, %48 : vector<2x128xf32>
    %51 = arith.divf %49, %50 : vector<2x128xf32>
    %52 = math.tanh %46 : vector<2x128xf32>
    %53 = vector.extract_strided_slice %51 {offsets = [0, 0], sizes = [2, 32], strides = [1, 1]} : vector<2x128xf32> to vector<2x32xf32>
    %54 = vector.extract_strided_slice %51 {offsets = [0, 32], sizes = [2, 32], strides = [1, 1]} : vector<2x128xf32> to vector<2x32xf32>
    %55 = vector.extract_strided_slice %52 {offsets = [0, 64], sizes = [2, 32], strides = [1, 1]} : vector<2x128xf32> to vector<2x32xf32>
    %56 = vector.extract_strided_slice %51 {offsets = [0, 96], sizes = [2, 32], strides = [1, 1]} : vector<2x128xf32> to vector<2x32xf32>
    %57 = arith.mulf %54, %39 : vector<2x32xf32>
    %58 = arith.mulf %53, %55 : vector<2x32xf32>
    %59 = arith.addf %57, %58 : vector<2x32xf32>
    %60 = math.tanh %59 : vector<2x32xf32>
    %61 = arith.mulf %56, %60 : vector<2x32xf32>
    %c0_20 = arith.constant 0 : index
    %c64 = arith.constant 64 : index
    %62 = vector.load %arg4[%c0_20, %c64] : memref<2x256xf32, #tpu.memory_space<vmem>>, vector<2x32xf32>
    tpu.vector_store %arg4[%c0_20, %c64], %61 {strides = array<i32>} : memref<2x256xf32, #tpu.memory_space<vmem>>, vector<2x32xf32>,
    %c3 = arith.constant 3 : index
    %c0_21 = arith.constant 0 : index
    %c0_22 = arith.constant 0 : index
    %63 = vector.load %arg0[%c3, %c0_21, %c0_22] : memref<8x2x128xf32, #tpu.memory_space<vmem>>, vector<1x2x128xf32>
    %64 = vector.shape_cast %63 : vector<1x2x128xf32> to vector<2x128xf32>
    %cst_23 = arith.constant dense<0.000000e+00> : vector<2x128xf32>
    %65 = tpu.matmul %61, %0, %cst_23 {dimension_numbers = #tpu.dot_dimension_numbers<[1], [0], [0], [1], [0, 0, 1, 1], [], []>} : vector<2x32xf32>, vector<32x128xf32>, vector<2x128xf32> -> vector<2x128xf32>
    %66 = arith.addf %64, %65 : vector<2x128xf32>
    %67 = arith.negf %66 : vector<2x128xf32>
    %68 = math.exp %67 : vector<2x128xf32>
    %cst_24 = arith.constant 1.000000e+00 : f32
    %69 = vector.broadcast %cst_24 : f32 to vector<2x128xf32>
    %70 = arith.addf %69, %68 : vector<2x128xf32>
    %71 = arith.divf %69, %70 : vector<2x128xf32>
    %72 = math.tanh %66 : vector<2x128xf32>
    %73 = vector.extract_strided_slice %71 {offsets = [0, 0], sizes = [2, 32], strides = [1, 1]} : vector<2x128xf32> to vector<2x32xf32>
    %74 = vector.extract_strided_slice %71 {offsets = [0, 32], sizes = [2, 32], strides = [1, 1]} : vector<2x128xf32> to vector<2x32xf32>
    %75 = vector.extract_strided_slice %72 {offsets = [0, 64], sizes = [2, 32], strides = [1, 1]} : vector<2x128xf32> to vector<2x32xf32>
    %76 = vector.extract_strided_slice %71 {offsets = [0, 96], sizes = [2, 32], strides = [1, 1]} : vector<2x128xf32> to vector<2x32xf32>
    %77 = arith.mulf %74, %59 : vector<2x32xf32>
    %78 = arith.mulf %73, %75 : vector<2x32xf32>
    %79 = arith.addf %77, %78 : vector<2x32xf32>
    %80 = math.tanh %79 : vector<2x32xf32>
    %81 = arith.mulf %76, %80 : vector<2x32xf32>
    %c0_25 = arith.constant 0 : index
    %c96 = arith.constant 96 : index
    %82 = vector.load %arg4[%c0_25, %c96] : memref<2x256xf32, #tpu.memory_space<vmem>>, vector<2x32xf32>
    tpu.vector_store %arg4[%c0_25, %c96], %81 {strides = array<i32>} : memref<2x256xf32, #tpu.memory_space<vmem>>, vector<2x32xf32>,
    %c4 = arith.constant 4 : index
    %c0_26 = arith.constant 0 : index
    %c0_27 = arith.constant 0 : index
    %83 = vector.load %arg0[%c4, %c0_26, %c0_27] : memref<8x2x128xf32, #tpu.memory_space<vmem>>, vector<1x2x128xf32>
    %84 = vector.shape_cast %83 : vector<1x2x128xf32> to vector<2x128xf32>
    %cst_28 = arith.constant dense<0.000000e+00> : vector<2x128xf32>
    %85 = tpu.matmul %81, %0, %cst_28 {dimension_numbers = #tpu.dot_dimension_numbers<[1], [0], [0], [1], [0, 0, 1, 1], [], []>} : vector<2x32xf32>, vector<32x128xf32>, vector<2x128xf32> -> vector<2x128xf32>
    %86 = arith.addf %84, %85 : vector<2x128xf32>
    %87 = arith.negf %86 : vector<2x128xf32>
    %88 = math.exp %87 : vector<2x128xf32>
    %cst_29 = arith.constant 1.000000e+00 : f32
    %89 = vector.broadcast %cst_29 : f32 to vector<2x128xf32>
    %90 = arith.addf %89, %88 : vector<2x128xf32>
    %91 = arith.divf %89, %90 : vector<2x128xf32>
    %92 = math.tanh %86 : vector<2x128xf32>
    %93 = vector.extract_strided_slice %91 {offsets = [0, 0], sizes = [2, 32], strides = [1, 1]} : vector<2x128xf32> to vector<2x32xf32>
    %94 = vector.extract_strided_slice %91 {offsets = [0, 32], sizes = [2, 32], strides = [1, 1]} : vector<2x128xf32> to vector<2x32xf32>
    %95 = vector.extract_strided_slice %92 {offsets = [0, 64], sizes = [2, 32], strides = [1, 1]} : vector<2x128xf32> to vector<2x32xf32>
    %96 = vector.extract_strided_slice %91 {offsets = [0, 96], sizes = [2, 32], strides = [1, 1]} : vector<2x128xf32> to vector<2x32xf32>
    %97 = arith.mulf %94, %79 : vector<2x32xf32>
    %98 = arith.mulf %93, %95 : vector<2x32xf32>
    %99 = arith.addf %97, %98 : vector<2x32xf32>
    %100 = math.tanh %99 : vector<2x32xf32>
    %101 = arith.mulf %96, %100 : vector<2x32xf32>
    %c0_30 = arith.constant 0 : index
    %c128 = arith.constant 128 : index
    %102 = vector.load %arg4[%c0_30, %c128] : memref<2x256xf32, #tpu.memory_space<vmem>>, vector<2x32xf32>
    tpu.vector_store %arg4[%c0_30, %c128], %101 {strides = array<i32>} : memref<2x256xf32, #tpu.memory_space<vmem>>, vector<2x32xf32>,
    %c5 = arith.constant 5 : index
    %c0_31 = arith.constant 0 : index
    %c0_32 = arith.constant 0 : index
    %103 = vector.load %arg0[%c5, %c0_31, %c0_32] : memref<8x2x128xf32, #tpu.memory_space<vmem>>, vector<1x2x128xf32>
    %104 = vector.shape_cast %103 : vector<1x2x128xf32> to vector<2x128xf32>
    %cst_33 = arith.constant dense<0.000000e+00> : vector<2x128xf32>
    %105 = tpu.matmul %101, %0, %cst_33 {dimension_numbers = #tpu.dot_dimension_numbers<[1], [0], [0], [1], [0, 0, 1, 1], [], []>} : vector<2x32xf32>, vector<32x128xf32>, vector<2x128xf32> -> vector<2x128xf32>
    %106 = arith.addf %104, %105 : vector<2x128xf32>
    %107 = arith.negf %106 : vector<2x128xf32>
    %108 = math.exp %107 : vector<2x128xf32>
    %cst_34 = arith.constant 1.000000e+00 : f32
    %109 = vector.broadcast %cst_34 : f32 to vector<2x128xf32>
    %110 = arith.addf %109, %108 : vector<2x128xf32>
    %111 = arith.divf %109, %110 : vector<2x128xf32>
    %112 = math.tanh %106 : vector<2x128xf32>
    %113 = vector.extract_strided_slice %111 {offsets = [0, 0], sizes = [2, 32], strides = [1, 1]} : vector<2x128xf32> to vector<2x32xf32>
    %114 = vector.extract_strided_slice %111 {offsets = [0, 32], sizes = [2, 32], strides = [1, 1]} : vector<2x128xf32> to vector<2x32xf32>
    %115 = vector.extract_strided_slice %112 {offsets = [0, 64], sizes = [2, 32], strides = [1, 1]} : vector<2x128xf32> to vector<2x32xf32>
    %116 = vector.extract_strided_slice %111 {offsets = [0, 96], sizes = [2, 32], strides = [1, 1]} : vector<2x128xf32> to vector<2x32xf32>
    %117 = arith.mulf %114, %99 : vector<2x32xf32>
    %118 = arith.mulf %113, %115 : vector<2x32xf32>
    %119 = arith.addf %117, %118 : vector<2x32xf32>
    %120 = math.tanh %119 : vector<2x32xf32>
    %121 = arith.mulf %116, %120 : vector<2x32xf32>
    %c0_35 = arith.constant 0 : index
    %c160 = arith.constant 160 : index
    %122 = vector.load %arg4[%c0_35, %c160] : memref<2x256xf32, #tpu.memory_space<vmem>>, vector<2x32xf32>
    tpu.vector_store %arg4[%c0_35, %c160], %121 {strides = array<i32>} : memref<2x256xf32, #tpu.memory_space<vmem>>, vector<2x32xf32>,
    %c6 = arith.constant 6 : index
    %c0_36 = arith.constant 0 : index
    %c0_37 = arith.constant 0 : index
    %123 = vector.load %arg0[%c6, %c0_36, %c0_37] : memref<8x2x128xf32, #tpu.memory_space<vmem>>, vector<1x2x128xf32>
    %124 = vector.shape_cast %123 : vector<1x2x128xf32> to vector<2x128xf32>
    %cst_38 = arith.constant dense<0.000000e+00> : vector<2x128xf32>
    %125 = tpu.matmul %121, %0, %cst_38 {dimension_numbers = #tpu.dot_dimension_numbers<[1], [0], [0], [1], [0, 0, 1, 1], [], []>} : vector<2x32xf32>, vector<32x128xf32>, vector<2x128xf32> -> vector<2x128xf32>
    %126 = arith.addf %124, %125 : vector<2x128xf32>
    %127 = arith.negf %126 : vector<2x128xf32>
    %128 = math.exp %127 : vector<2x128xf32>
    %cst_39 = arith.constant 1.000000e+00 : f32
    %129 = vector.broadcast %cst_39 : f32 to vector<2x128xf32>
    %130 = arith.addf %129, %128 : vector<2x128xf32>
    %131 = arith.divf %129, %130 : vector<2x128xf32>
    %132 = math.tanh %126 : vector<2x128xf32>
    %133 = vector.extract_strided_slice %131 {offsets = [0, 0], sizes = [2, 32], strides = [1, 1]} : vector<2x128xf32> to vector<2x32xf32>
    %134 = vector.extract_strided_slice %131 {offsets = [0, 32], sizes = [2, 32], strides = [1, 1]} : vector<2x128xf32> to vector<2x32xf32>
    %135 = vector.extract_strided_slice %132 {offsets = [0, 64], sizes = [2, 32], strides = [1, 1]} : vector<2x128xf32> to vector<2x32xf32>
    %136 = vector.extract_strided_slice %131 {offsets = [0, 96], sizes = [2, 32], strides = [1, 1]} : vector<2x128xf32> to vector<2x32xf32>
    %137 = arith.mulf %134, %119 : vector<2x32xf32>
    %138 = arith.mulf %133, %135 : vector<2x32xf32>
    %139 = arith.addf %137, %138 : vector<2x32xf32>
    %140 = math.tanh %139 : vector<2x32xf32>
    %141 = arith.mulf %136, %140 : vector<2x32xf32>
    %c0_40 = arith.constant 0 : index
    %c192 = arith.constant 192 : index
    %142 = vector.load %arg4[%c0_40, %c192] : memref<2x256xf32, #tpu.memory_space<vmem>>, vector<2x32xf32>
    tpu.vector_store %arg4[%c0_40, %c192], %141 {strides = array<i32>} : memref<2x256xf32, #tpu.memory_space<vmem>>, vector<2x32xf32>,
    %c7 = arith.constant 7 : index
    %c0_41 = arith.constant 0 : index
    %c0_42 = arith.constant 0 : index
    %143 = vector.load %arg0[%c7, %c0_41, %c0_42] : memref<8x2x128xf32, #tpu.memory_space<vmem>>, vector<1x2x128xf32>
    %144 = vector.shape_cast %143 : vector<1x2x128xf32> to vector<2x128xf32>
    %cst_43 = arith.constant dense<0.000000e+00> : vector<2x128xf32>
    %145 = tpu.matmul %141, %0, %cst_43 {dimension_numbers = #tpu.dot_dimension_numbers<[1], [0], [0], [1], [0, 0, 1, 1], [], []>} : vector<2x32xf32>, vector<32x128xf32>, vector<2x128xf32> -> vector<2x128xf32>
    %146 = arith.addf %144, %145 : vector<2x128xf32>
    %147 = arith.negf %146 : vector<2x128xf32>
    %148 = math.exp %147 : vector<2x128xf32>
    %cst_44 = arith.constant 1.000000e+00 : f32
    %149 = vector.broadcast %cst_44 : f32 to vector<2x128xf32>
    %150 = arith.addf %149, %148 : vector<2x128xf32>
    %151 = arith.divf %149, %150 : vector<2x128xf32>
    %152 = math.tanh %146 : vector<2x128xf32>
    %153 = vector.extract_strided_slice %151 {offsets = [0, 0], sizes = [2, 32], strides = [1, 1]} : vector<2x128xf32> to vector<2x32xf32>
    %154 = vector.extract_strided_slice %151 {offsets = [0, 32], sizes = [2, 32], strides = [1, 1]} : vector<2x128xf32> to vector<2x32xf32>
    %155 = vector.extract_strided_slice %152 {offsets = [0, 64], sizes = [2, 32], strides = [1, 1]} : vector<2x128xf32> to vector<2x32xf32>
    %156 = vector.extract_strided_slice %151 {offsets = [0, 96], sizes = [2, 32], strides = [1, 1]} : vector<2x128xf32> to vector<2x32xf32>
    %157 = arith.mulf %154, %139 : vector<2x32xf32>
    %158 = arith.mulf %153, %155 : vector<2x32xf32>
    %159 = arith.addf %157, %158 : vector<2x32xf32>
    %160 = math.tanh %159 : vector<2x32xf32>
    %161 = arith.mulf %156, %160 : vector<2x32xf32>
    %c0_45 = arith.constant 0 : index
    %c224 = arith.constant 224 : index
    %162 = vector.load %arg4[%c0_45, %c224] : memref<2x256xf32, #tpu.memory_space<vmem>>, vector<2x32xf32>
    tpu.vector_store %arg4[%c0_45, %c224], %161 {strides = array<i32>} : memref<2x256xf32, #tpu.memory_space<vmem>>, vector<2x32xf32>,
    %c0_46 = arith.constant 0 : index
    %c0_47 = arith.constant 0 : index
    %163 = vector.load %arg5[%c0_46, %c0_47] : memref<2x32xf32, #tpu.memory_space<vmem>>, vector<2x32xf32>
    tpu.vector_store %arg5[%c0_46, %c0_47], %161 {strides = array<i32>} : memref<2x32xf32, #tpu.memory_space<vmem>>, vector<2x32xf32>,
    %c0_48 = arith.constant 0 : index
    %c0_49 = arith.constant 0 : index
    %164 = vector.load %arg6[%c0_48, %c0_49] : memref<2x32xf32, #tpu.memory_space<vmem>>, vector<2x32xf32>
    tpu.vector_store %arg6[%c0_48, %c0_49], %159 {strides = array<i32>} : memref<2x32xf32, #tpu.memory_space<vmem>>, vector<2x32xf32>,
    return
  }
}

</mosaic_0001>

<bundles_post_ra>
// kernel: lstm2_forward.1
= control target key start
LH: loop header
LB: loop body
LE: loop exit
PB: predicated region body
PF: predicated region fallthrough
CT: control target
= control target key end

     0   :  { %12 = vsyncpa [#allocation3], 0  ;;  %s944_s0 = inlined_call_operand.vmem [shape: f32[8,2,128], index: 0, kind: input, shape index: {}]   ;;  %s945_s1 = inlined_call_operand.vmem [shape: f32[32,128], index: 1, kind: input, shape index: {}]   ;;  %s946_s2 = inlined_call_operand.vmem [shape: f32[2,32], index: 2, kind: input, shape index: {}]   ;;  %s947_s3 = inlined_call_operand.vmem [shape: f32[2,32], index: 3, kind: input, shape index: {}]   ;;  %s948_s4 = inlined_call_operand.vmem [shape: f32[2,256], index: 4, kind: output, shape index: {0}]   ;;  %s949_s5 = inlined_call_operand.hbm [shape: f32[2,32], index: 5, kind: output, shape index: {1}]   ;;  %s950_s6 = inlined_call_operand.hbm [shape: f32[2,32], index: 6, kind: output, shape index: {2}]  }
   0x1   :  { %v25_v0 = vld [vmem:[%s945_s1 + $0x18] sm:$0xff]  ;;  %v24_v1 = vld [vmem:[%s945_s1 + $0x10] sm:$0xff]  ;;  %v23_v2 = vld [vmem:[%s945_s1 + $0x8] sm:$0xff] }
   0x2   :  { %45 = vmatpush.msra.mxu0 %v25_v0  ;;  %117 = vmatpush.msra.mxu1 %v25_v0 }
   0x3   :  { %187 = vmatpush.msra.mxu2 %v25_v0  ;;  %257 = vmatpush.msra.mxu3 %v25_v0 }
   0x4   :  { %13 = vsyncpa [#allocation5], 0  ;;  %46 = vmatpush.msra.mxu0 %v24_v1  ;;  %118 = vmatpush.msra.mxu1 %v24_v1  ;;  %v22_v3 = vld [vmem:[%s945_s1] sm:$0xff]  ;;  %vm29_vm0 = vcmask 261120   ;;  %s766_s7 = smov 64   ;;  %s767_s10 = smov 32  }
   0x5   :  { %188 = vmatpush.msra.mxu2 %v24_v1  ;;  %258 = vmatpush.msra.mxu3 %v24_v1  ;;  %v26_v4 = vld [vmem:[%s946_s2] sm:$0x3]  ;;  %vm99_vm5 = vcmask 254976   ;;  %v624_v33 = vld [vmem:[%s944_s0 + $0x2] sm:$0x3]  ;;  %s768_s28 = smov 96  }
   0x6   :  { %47 = vmatpush.msra.mxu0 %v23_v2  ;;  %119 = vmatpush.msra.mxu1 %v23_v2  ;;  %v28_v5 = vld [vmem:[%s944_s0] sm:$0x3]  ;;  %v627_v59 = vld [vmem:[%s944_s0 + $0x4] sm:$0x3]  ;;  %s769_s14 = smov [#allocation4]   ;;  %s606_s18 = sshll.u32 %s950_s6, 4  ;;  %s607_s18 = int_to_ptr.hbm [resolvable:$true] %s606_s18 }
   0x7   :  { %189 = vmatpush.msra.mxu2 %v23_v2  ;;  %259 = vmatpush.msra.mxu3 %v23_v2  ;;  %v27_v9 = vld [vmem:[%s947_s3] sm:$0x3]  ;;  %s604_s15 = sshll.u32 %s769_s14, 4  ;;  %s595_s22 = sshll.u32 %s949_s5, 4  ;;  %s605_s15 = int_to_ptr.vmem [resolvable:$true] %s604_s15  ;;  %s596_s22 = int_to_ptr.hbm [resolvable:$true] %s595_s22 }
   0x8   :  { %48 = vmatpush.msra.mxu0 %v22_v3  ;;  %120 = vmatpush.msra.mxu1 %v22_v3 }
   0x9   :  { %622 = vmatmul.msk.f32.vlgmr.msra.gmra.mxu0 %vm29_vm0, %v26_v4  ;;  %190 = vmatpush.msra.mxu2 %v22_v3 }
   0xa   :  { %260 = vmatpush.msra.mxu3 %v22_v3  ;;  %324 = vmatpush.msrb.mxu0 %v25_v0 }
   0xb   :  { %391 = vmatpush.msrb.mxu1 %v25_v0  ;;  %460 = vmatpush.msrb.mxu2 %v25_v0 }
   0xc   :  { %325 = vmatpush.msrb.mxu0 %v24_v1  ;;  %529 = vmatpush.msrb.mxu3 %v25_v0 }
   0xd   :  { %392 = vmatpush.msrb.mxu1 %v24_v1  ;;  %461 = vmatpush.msrb.mxu2 %v24_v1 }
   0xe   :  { %326 = vmatpush.msrb.mxu0 %v23_v2  ;;  %530 = vmatpush.msrb.mxu3 %v24_v1 }
   0xf   :  { %393 = vmatpush.msrb.mxu1 %v23_v2  ;;  %462 = vmatpush.msrb.mxu2 %v23_v2 }
  0x10   :  { %327 = vmatpush.msrb.mxu0 %v22_v3  ;;  %531 = vmatpush.msrb.mxu3 %v23_v2 }
  0x11   :  { %394 = vmatpush.msrb.mxu1 %v22_v3  ;;  %463 = vmatpush.msrb.mxu2 %v22_v3 }
  0x12   :  { %532 = vmatpush.msrb.mxu3 %v22_v3 }
  0x86   :  { %v50_v6 = vpop.f32.mrf.mxu0 }
  0x87   :  { %v53_v7 = vadd.f32 %v50_v6, %v28_v5 }
  0x89   :  { %650 = vtanh.f32 %v53_v7  ;;  %v623_v10 = vmul.f32 -1.442695, %v53_v7 }
  0x8b   :  { %652 = vpow2.f32 %v623_v10 }
  0x8f   :  { %v651_v8 = vpop.eup %650 }
  0x90   :  { %80 = vrot.lane.b32.xlu0 %v651_v8, %s766_s7 }
  0x91   :  { %v653_v11 = vpop.eup %652 }
  0x92   :  { %v57_v12 = vadd.f32 1.0, %v653_v11 }
  0x94   :  { %654 = vrcp.f32 %v57_v12  ;;  %v69_v18 = vand.u32 2147483648, %v57_v12  ;;  %vm63_vm2 = vweird.f32 %v57_v12  ;;  %v67_v19 = vand.u32 2147483647, %v57_v12 }
  0x96   :  { %v70_v21 = vor.u32 1.1754944e-38, %v69_v18  ;;  %vm68_vm4 = vcmp.eq.f32.partialorder %v67_v19, 8.507059e+37 }
  0x98   :  { %75 = vrot.lane.b32.xlu0 %v27_v9, %s767_s10 }
  0x9a   :  { %v655_v13 = vpop.eup %654 }
  0x9b   :  { %v59_v14 = vmul.f32 %v655_v13, %v57_v12  ;;  %vm64_vm1 = vweird.f32 %v655_v13 }
  0x9c   :  { %vm65_vm3 = vmor %vm63_vm2, %vm64_vm1 }
  0x9d   :  { %v60_v15 = vsub.f32 1.0, %v59_v14 }
  0x9f   :  { %v61_v16 = vmul.f32 %v655_v13, %v60_v15 }
  0xa1   :  { %v62_v17 = vadd.f32 %v655_v13, %v61_v16 }
  0xa3   :  { %v66_v20 = vsel %vm65_vm3, %v655_v13, %v62_v17 }
  0xa4   :  { %v71_v23 = vsel %vm68_vm4, %v70_v21, %v66_v20  ;;  %v630_v21 = vld [vmem:[%s944_s0 + $0x6] sm:$0x3] }
 0x102   :  { %v81_v22 = vpop.permute.xlu0 %80 }
 0x103   :  { %v83_v24 = vmul.f32 %v81_v22, %v71_v23 }
 0x105   :  { %85 = vrot.lane.b32.xlu1 %v83_v24, %s767_s10 }
 0x10a   :  { %v76_v25 = vpop.permute.xlu0 %75 }
 0x10b   :  { %v78_v26 = vmul.f32 %v76_v25, %v71_v23 }
 0x177   :  { %v86_v27 = vpop.permute.xlu1 %85 }
 0x178   :  { %v88_v28 = vadd.f32 %v86_v27, %v78_v26 }
 0x17a   :  { %656 = vtanh.f32 %v88_v28 }
 0x180   :  { %v657_v29 = vpop.eup %656 }
 0x181   :  { %91 = vrot.lane.b32.xlu1 %v657_v29, %s766_s7 }
 0x1f3   :  { %v92_v30 = vpop.permute.xlu1 %91 }
 0x1f4   :  { %v94_v31 = vmul.f32 %v92_v30, %v71_v23 }
 0x1f6   :  { %96 = vrot.lane.b32.xlu2 %v94_v31, %s767_s10 }
 0x250   :  { %v97_v32 = vpop.permute.xlu2 %96 }
 0x251   :  { %100 = vst.msk [vmem:[%s948_s4] sm:$0x3] %vm99_vm5, %v97_v32  ;;  %625 = vmatmul.msk.f32.vlgmr.msra.gmra.mxu1 %vm29_vm0, %v97_v32 }
 0x2ce   :  { %v122_v34 = vpop.f32.mrf.mxu1 }
 0x2cf   :  { %v125_v35 = vadd.f32 %v624_v33, %v122_v34 }
 0x2d1   :  { %658 = vtanh.f32 %v125_v35  ;;  %v626_v37 = vmul.f32 -1.442695, %v125_v35 }
 0x2d3   :  { %660 = vpow2.f32 %v626_v37 }
 0x2d7   :  { %v659_v36 = vpop.eup %658 }
 0x2d8   :  { %148 = vrot.lane.b32.xlu2 %v659_v36, %s766_s7 }
 0x2d9   :  { %v661_v38 = vpop.eup %660 }
 0x2da   :  { %v129_v39 = vadd.f32 1.0, %v661_v38 }
 0x2dc   :  { %662 = vrcp.f32 %v129_v39  ;;  %v141_v45 = vand.u32 2147483648, %v129_v39  ;;  %vm135_vm7 = vweird.f32 %v129_v39  ;;  %v139_v46 = vand.u32 2147483647, %v129_v39 }
 0x2de   :  { %v142_v48 = vor.u32 1.1754944e-38, %v141_v45  ;;  %vm140_vm9 = vcmp.eq.f32.partialorder %v139_v46, 8.507059e+37 }
 0x2e2   :  { %v663_v40 = vpop.eup %662 }
 0x2e3   :  { %v131_v41 = vmul.f32 %v663_v40, %v129_v39  ;;  %vm136_vm6 = vweird.f32 %v663_v40 }
 0x2e4   :  { %vm137_vm8 = vmor %vm135_vm7, %vm136_vm6 }
 0x2e5   :  { %v132_v42 = vsub.f32 1.0, %v131_v41 }
 0x2e7   :  { %v133_v43 = vmul.f32 %v663_v40, %v132_v42 }
 0x2e9   :  { %v134_v44 = vadd.f32 %v663_v40, %v133_v43 }
 0x2eb   :  { %v138_v47 = vsel %vm137_vm8, %v663_v40, %v134_v44 }
 0x2ec   :  { %v143_v50 = vsel %vm140_vm9, %v142_v48, %v138_v47  ;;  %v633_v47 = vld [vmem:[%s944_s0 + $0x8] sm:$0x3] }
 0x2ed   :  { %v146_v52 = vmul.f32 %v143_v50, %v88_v28 }
 0x332   :  { %v149_v49 = vpop.permute.xlu2 %148 }
 0x333   :  { %v151_v51 = vmul.f32 %v149_v49, %v143_v50 }
 0x335   :  { %153 = vrot.lane.b32.xlu0 %v151_v51, %s767_s10 }
 0x3a7   :  { %v154_v53 = vpop.permute.xlu0 %153 }
 0x3a8   :  { %v156_v54 = vadd.f32 %v154_v53, %v146_v52 }
 0x3aa   :  { %664 = vtanh.f32 %v156_v54 }
 0x3b0   :  { %v665_v55 = vpop.eup %664 }
 0x3b1   :  { %159 = vrot.lane.b32.xlu1 %v665_v55, %s766_s7 }
 0x423   :  { %v160_v56 = vpop.permute.xlu1 %159 }
 0x424   :  { %v844_v57 = vmul.f32 %v160_v56, %v143_v50 }
 0x426   :  { %171 = vrot.lane.b32.xlu2 %v844_v57, %s767_s10 }
 0x480   :  { %v172_v58 = vpop.permute.xlu2 %171 }
 0x481   :  { %628 = vmatmul.msk.f32.vlgmr.msra.gmra.mxu2 %vm29_vm0, %v172_v58 }
 0x504   :  { %v192_v60 = vpop.f32.mrf.mxu2 }
 0x505   :  { %v195_v61 = vadd.f32 %v627_v59, %v192_v60 }
 0x507   :  { %666 = vtanh.f32 %v195_v61  ;;  %v629_v63 = vmul.f32 -1.442695, %v195_v61 }
 0x509   :  { %668 = vpow2.f32 %v629_v63 }
 0x50d   :  { %v667_v62 = vpop.eup %666 }
 0x50e   :  { %218 = vrot.lane.b32.xlu0 %v667_v62, %s766_s7 }
 0x50f   :  { %v669_v0 = vpop.eup %668 }
 0x510   :  { %v199_v1 = vadd.f32 1.0, %v669_v0 }
 0x512   :  { %670 = vrcp.f32 %v199_v1  ;;  %v211_v7 = vand.u32 2147483648, %v199_v1  ;;  %vm205_vm11 = vweird.f32 %v199_v1  ;;  %v209_v8 = vand.u32 2147483647, %v199_v1 }
 0x514   :  { %v212_v10 = vor.u32 1.1754944e-38, %v211_v7  ;;  %vm210_vm13 = vcmp.eq.f32.partialorder %v209_v8, 8.507059e+37 }
 0x518   :  { %v671_v2 = vpop.eup %670 }
 0x519   :  { %v201_v3 = vmul.f32 %v671_v2, %v199_v1  ;;  %vm206_vm10 = vweird.f32 %v671_v2 }
 0x51a   :  { %vm207_vm12 = vmor %vm205_vm11, %vm206_vm10 }
 0x51b   :  { %v202_v4 = vsub.f32 1.0, %v201_v3 }
 0x51d   :  { %v203_v5 = vmul.f32 %v671_v2, %v202_v4 }
 0x51f   :  { %v204_v6 = vadd.f32 %v671_v2, %v203_v5 }
 0x521   :  { %v208_v9 = vsel %vm207_vm12, %v671_v2, %v204_v6 }
 0x522   :  { %v213_v12 = vsel %vm210_vm13, %v212_v10, %v208_v9  ;;  %v636_v10 = vld [vmem:[%s944_s0 + $0xa] sm:$0x3] }
 0x523   :  { %v216_v14 = vmul.f32 %v213_v12, %v156_v54 }
 0x580   :  { %v219_v11 = vpop.permute.xlu0 %218 }
 0x581   :  { %v221_v13 = vmul.f32 %v219_v11, %v213_v12 }
 0x583   :  { %223 = vrot.lane.b32.xlu1 %v221_v13, %s767_s10 }
 0x5f5   :  { %v224_v15 = vpop.permute.xlu1 %223 }
 0x5f6   :  { %v226_v16 = vadd.f32 %v224_v15, %v216_v14 }
 0x5f8   :  { %672 = vtanh.f32 %v226_v16 }
 0x5fe   :  { %v673_v17 = vpop.eup %672 }
 0x5ff   :  { %229 = vrot.lane.b32.xlu2 %v673_v17, %s766_s7 }
 0x659   :  { %v230_v18 = vpop.permute.xlu2 %229 }
 0x65a   :  { %v855_v19 = vmul.f32 %v230_v18, %v213_v12 }
 0x65c   :  { %241 = vrot.lane.b32.xlu0 %v855_v19, %s767_s10 }
 0x6ce   :  { %v242_v20 = vpop.permute.xlu0 %241 }
 0x6cf   :  { %631 = vmatmul.msk.f32.vlgmr.msra.gmra.mxu3 %vm29_vm0, %v242_v20 }
 0x752   :  { %v262_v22 = vpop.f32.mrf.mxu3 }
 0x753   :  { %v265_v23 = vadd.f32 %v630_v21, %v262_v22 }
 0x755   :  { %674 = vtanh.f32 %v265_v23  ;;  %v632_v25 = vmul.f32 -1.442695, %v265_v23 }
 0x757   :  { %676 = vpow2.f32 %v632_v25 }
 0x75b   :  { %v675_v24 = vpop.eup %674 }
 0x75c   :  { %288 = vrot.lane.b32.xlu1 %v675_v24, %s766_s7 }
 0x75d   :  { %v677_v26 = vpop.eup %676 }
 0x75e   :  { %v269_v27 = vadd.f32 1.0, %v677_v26 }
 0x760   :  { %678 = vrcp.f32 %v269_v27  ;;  %v281_v33 = vand.u32 2147483648, %v269_v27  ;;  %vm275_vm15 = vweird.f32 %v269_v27  ;;  %v279_v34 = vand.u32 2147483647, %v269_v27 }
 0x762   :  { %v282_v36 = vor.u32 1.1754944e-38, %v281_v33  ;;  %vm280_vm2 = vcmp.eq.f32.partialorder %v279_v34, 8.507059e+37 }
 0x766   :  { %v679_v28 = vpop.eup %678 }
 0x767   :  { %v271_v29 = vmul.f32 %v679_v28, %v269_v27  ;;  %vm276_vm14 = vweird.f32 %v679_v28 }
 0x768   :  { %vm277_vm1 = vmor %vm275_vm15, %vm276_vm14 }
 0x769   :  { %v272_v30 = vsub.f32 1.0, %v271_v29 }
 0x76b   :  { %v273_v31 = vmul.f32 %v679_v28, %v272_v30 }
 0x76d   :  { %v274_v32 = vadd.f32 %v679_v28, %v273_v31 }
 0x76f   :  { %v278_v35 = vsel %vm277_vm1, %v679_v28, %v274_v32 }
 0x770   :  { %v283_v38 = vsel %vm280_vm2, %v282_v36, %v278_v35 }
 0x771   :  { %v286_v40 = vmul.f32 %v283_v38, %v226_v16 }
 0x7ce   :  { %v289_v37 = vpop.permute.xlu1 %288 }
 0x7cf   :  { %v291_v39 = vmul.f32 %v289_v37, %v283_v38  ;;  %v639_v37 = vld [vmem:[%s944_s0 + $0xc] sm:$0x3] }
 0x7d1   :  { %293 = vrot.lane.b32.xlu2 %v291_v39, %s767_s10 }
 0x82b   :  { %v294_v41 = vpop.permute.xlu2 %293 }
 0x82c   :  { %v296_v42 = vadd.f32 %v294_v41, %v286_v40 }
 0x82e   :  { %680 = vtanh.f32 %v296_v42 }
 0x834   :  { %v681_v43 = vpop.eup %680 }
 0x835   :  { %299 = vrot.lane.b32.xlu0 %v681_v43, %s766_s7 }
 0x8a7   :  { %v300_v44 = vpop.permute.xlu0 %299 }
 0x8a8   :  { %v866_v45 = vmul.f32 %v300_v44, %v283_v38 }
 0x8aa   :  { %308 = vrot.lane.b32.xlu1 %v866_v45, %s767_s10 }
 0x91c   :  { %v309_v46 = vpop.permute.xlu1 %308 }
 0x91d   :  { %634 = vmatmul.msk.f32.vlgmr.msrb.gmra.mxu0 %vm29_vm0, %v309_v46 }
 0x99a   :  { %v329_v48 = vpop.f32.mrf.mxu0 }
 0x99b   :  { %v332_v49 = vadd.f32 %v633_v47, %v329_v48 }
 0x99d   :  { %682 = vtanh.f32 %v332_v49  ;;  %v635_v51 = vmul.f32 -1.442695, %v332_v49 }
 0x99f   :  { %684 = vpow2.f32 %v635_v51 }
 0x9a3   :  { %v683_v50 = vpop.eup %682 }
 0x9a4   :  { %355 = vrot.lane.b32.xlu2 %v683_v50, %s766_s7 }
 0x9a5   :  { %v685_v52 = vpop.eup %684 }
 0x9a6   :  { %v336_v53 = vadd.f32 1.0, %v685_v52 }
 0x9a8   :  { %686 = vrcp.f32 %v336_v53  ;;  %v348_v60 = vand.u32 2147483648, %v336_v53  ;;  %vm342_vm4 = vweird.f32 %v336_v53  ;;  %v346_v61 = vand.u32 2147483647, %v336_v53 }
 0x9aa   :  { %v349_v63 = vor.u32 1.1754944e-38, %v348_v60  ;;  %vm347_vm7 = vcmp.eq.f32.partialorder %v346_v61, 8.507059e+37 }
 0x9ae   :  { %v687_v54 = vpop.eup %686 }
 0x9af   :  { %v338_v55 = vmul.f32 %v687_v54, %v336_v53  ;;  %vm343_vm3 = vweird.f32 %v687_v54 }
 0x9b0   :  { %vm344_vm6 = vmor %vm342_vm4, %vm343_vm3  ;;  %vm167_vm4 = vcmask 517376  }
 0x9b1   :  { %v339_v56 = vsub.f32 1.0, %v338_v55 }
 0x9b3   :  { %v340_v58 = vmul.f32 %v687_v54, %v339_v56 }
 0x9b5   :  { %v341_v59 = vadd.f32 %v687_v54, %v340_v58 }
 0x9b7   :  { %v345_v62 = vsel %vm344_vm6, %v687_v54, %v341_v59  ;;  %vm237_vm6 = vcmask 779776  }
 0x9b8   :  { %v350_v1 = vsel %vm347_vm7, %v349_v63, %v345_v62  ;;  %vm303_vm7 = vcmask 1042176  }
 0x9b9   :  { %v353_v3 = vmul.f32 %v350_v1, %v296_v42 }
 0x9fe   :  { %v356_v0 = vpop.permute.xlu2 %355 }
 0x9ff   :  { %v358_v2 = vmul.f32 %v356_v0, %v350_v1 }
 0xa01   :  { %360 = vrot.lane.b32.xlu0 %v358_v2, %s767_s10 }
 0xa73   :  { %v361_v4 = vpop.permute.xlu0 %360 }
 0xa74   :  { %v363_v5 = vadd.f32 %v361_v4, %v353_v3 }
 0xa76   :  { %688 = vtanh.f32 %v363_v5 }
 0xa7c   :  { %v689_v6 = vpop.eup %688 }
 0xa7d   :  { %366 = vrot.lane.b32.xlu1 %v689_v6, %s766_s7 }
 0xaef   :  { %v367_v7 = vpop.permute.xlu1 %366 }
 0xaf0   :  { %v369_v8 = vmul.f32 %v367_v7, %v350_v1  ;;  %v642_v1 = vld [vmem:[%s944_s0 + $0xe] sm:$0x3] }
 0xaf2   :  { %371 = vrot.lane.b32.xlu2 %v369_v8, %s767_s10 }
 0xb4c   :  { %v372_v9 = vpop.permute.xlu2 %371 }
 0xb4d   :  { %374 = vst.msk [vmem:[%s948_s4 + $0x2] sm:$0x3] %vm99_vm5, %v372_v9  ;;  %637 = vmatmul.msk.f32.vlgmr.msrb.gmra.mxu1 %vm29_vm0, %v372_v9 }
 0xbca   :  { %v396_v11 = vpop.f32.mrf.mxu1 }
 0xbcb   :  { %v399_v12 = vadd.f32 %v636_v10, %v396_v11 }
 0xbcd   :  { %690 = vtanh.f32 %v399_v12  ;;  %v638_v14 = vmul.f32 -1.442695, %v399_v12 }
 0xbcf   :  { %692 = vpow2.f32 %v638_v14 }
 0xbd3   :  { %v691_v13 = vpop.eup %690 }
 0xbd4   :  { %422 = vrot.lane.b32.xlu0 %v691_v13, %s766_s7 }
 0xbd5   :  { %v693_v15 = vpop.eup %692 }
 0xbd6   :  { %v403_v16 = vadd.f32 1.0, %v693_v15 }
 0xbd8   :  { %694 = vrcp.f32 %v403_v16  ;;  %v415_v23 = vand.u32 2147483648, %v403_v16  ;;  %vm409_vm9 = vweird.f32 %v403_v16  ;;  %v413_v24 = vand.u32 2147483647, %v403_v16 }
 0xbda   :  { %v416_v26 = vor.u32 1.1754944e-38, %v415_v23  ;;  %vm414_vm11 = vcmp.eq.f32.partialorder %v413_v24, 8.507059e+37 }
 0xbde   :  { %v695_v17 = vpop.eup %694 }
 0xbdf   :  { %v405_v18 = vmul.f32 %v695_v17, %v403_v16  ;;  %vm410_vm8 = vweird.f32 %v695_v17 }
 0xbe0   :  { %vm411_vm10 = vmor %vm409_vm9, %vm410_vm8 }
 0xbe1   :  { %v406_v20 = vsub.f32 1.0, %v405_v18 }
 0xbe3   :  { %v407_v21 = vmul.f32 %v695_v17, %v406_v20 }
 0xbe5   :  { %v408_v22 = vadd.f32 %v695_v17, %v407_v21 }
 0xbe7   :  { %v412_v25 = vsel %vm411_vm10, %v695_v17, %v408_v22 }
 0xbe8   :  { %v417_v28 = vsel %vm414_vm11, %v416_v26, %v412_v25 }
 0xbe9   :  { %v420_v30 = vmul.f32 %v417_v28, %v363_v5 }
 0xc46   :  { %v423_v27 = vpop.permute.xlu0 %422 }
 0xc47   :  { %v425_v29 = vmul.f32 %v423_v27, %v417_v28 }
 0xc49   :  { %427 = vrot.lane.b32.xlu1 %v425_v29, %s767_s10 }
 0xcbb   :  { %v428_v31 = vpop.permute.xlu1 %427 }
 0xcbc   :  { %v430_v32 = vadd.f32 %v428_v31, %v420_v30 }
 0xcbe   :  { %696 = vtanh.f32 %v430_v32 }
 0xcc4   :  { %v697_v33 = vpop.eup %696 }
 0xcc5   :  { %433 = vrot.lane.b32.xlu2 %v697_v33, %s766_s7 }
 0xd1f   :  { %v434_v34 = vpop.permute.xlu2 %433 }
 0xd20   :  { %v889_v35 = vmul.f32 %v434_v34, %v417_v28 }
 0xd22   :  { %444 = vrot.lane.b32.xlu0 %v889_v35, %s767_s10 }
 0xd94   :  { %v445_v36 = vpop.permute.xlu0 %444 }
 0xd95   :  { %640 = vmatmul.msk.f32.vlgmr.msrb.gmra.mxu2 %vm29_vm0, %v445_v36 }
 0xe18   :  { %v465_v38 = vpop.f32.mrf.mxu2 }
 0xe19   :  { %v468_v39 = vadd.f32 %v639_v37, %v465_v38 }
 0xe1b   :  { %698 = vtanh.f32 %v468_v39  ;;  %v641_v41 = vmul.f32 -1.442695, %v468_v39 }
 0xe1d   :  { %700 = vpow2.f32 %v641_v41 }
 0xe21   :  { %v699_v40 = vpop.eup %698 }
 0xe22   :  { %491 = vrot.lane.b32.xlu1 %v699_v40, %s766_s7 }
 0xe23   :  { %v701_v42 = vpop.eup %700 }
 0xe24   :  { %v472_v43 = vadd.f32 1.0, %v701_v42 }
 0xe26   :  { %702 = vrcp.f32 %v472_v43  ;;  %v484_v50 = vand.u32 2147483648, %v472_v43  ;;  %vm478_vm13 = vweird.f32 %v472_v43  ;;  %v482_v51 = vand.u32 2147483647, %v472_v43 }
 0xe28   :  { %v485_v53 = vor.u32 1.1754944e-38, %v484_v50  ;;  %vm483_vm15 = vcmp.eq.f32.partialorder %v482_v51, 8.507059e+37 }
 0xe2c   :  { %v703_v44 = vpop.eup %702 }
 0xe2d   :  { %v474_v46 = vmul.f32 %v703_v44, %v472_v43  ;;  %vm479_vm12 = vweird.f32 %v703_v44 }
 0xe2e   :  { %vm480_vm14 = vmor %vm478_vm13, %vm479_vm12 }
 0xe2f   :  { %v475_v47 = vsub.f32 1.0, %v474_v46 }
 0xe31   :  { %v476_v48 = vmul.f32 %v703_v44, %v475_v47 }
 0xe33   :  { %v477_v49 = vadd.f32 %v703_v44, %v476_v48 }
 0xe35   :  { %v481_v52 = vsel %vm480_vm14, %v703_v44, %v477_v49 }
 0xe36   :  { %v486_v55 = vsel %vm483_vm15, %v485_v53, %v481_v52 }
 0xe37   :  { %v489_v58 = vmul.f32 %v486_v55, %v430_v32 }
 0xe94   :  { %v492_v54 = vpop.permute.xlu1 %491 }
 0xe95   :  { %v494_v56 = vmul.f32 %v492_v54, %v486_v55 }
 0xe97   :  { %496 = vrot.lane.b32.xlu2 %v494_v56, %s767_s10 }
 0xef1   :  { %v497_v59 = vpop.permute.xlu2 %496 }
 0xef2   :  { %v499_v60 = vadd.f32 %v497_v59, %v489_v58 }
 0xef4   :  { %704 = vtanh.f32 %v499_v60 }
 0xefa   :  { %v705_v61 = vpop.eup %704 }
 0xefb   :  { %502 = vrot.lane.b32.xlu0 %v705_v61, %s766_s7 }
 0xf6d   :  { %v503_v62 = vpop.permute.xlu0 %502 }
 0xf6e   :  { %v505_v63 = vmul.f32 %v503_v62, %v486_v55 }
 0xf70   :  { %513 = vrot.lane.b32.xlu1 %v505_v63, %s767_s10 }
 0xfe2   :  { %v514_v0 = vpop.permute.xlu1 %513 }
 0xfe3   :  { %643 = vmatmul.msk.f32.vlgmr.msrb.gmra.mxu3 %vm29_vm0, %v514_v0 }
0x1066   :  { %v534_v2 = vpop.f32.mrf.mxu3 }
0x1067   :  { %v537_v3 = vadd.f32 %v642_v1, %v534_v2 }
0x1069   :  { %706 = vtanh.f32 %v537_v3  ;;  %v644_v5 = vmul.f32 -1.442695, %v537_v3 }
0x106b   :  { %708 = vpow2.f32 %v644_v5 }
0x106f   :  { %v707_v4 = vpop.eup %706 }
0x1070   :  { %560 = vrot.lane.b32.xlu2 %v707_v4, %s766_s7 }
0x1071   :  { %v709_v6 = vpop.eup %708 }
0x1072   :  { %v541_v7 = vadd.f32 1.0, %v709_v6 }
0x1074   :  { %710 = vrcp.f32 %v541_v7  ;;  %v553_v13 = vand.u32 2147483648, %v541_v7  ;;  %vm547_vm1 = vweird.f32 %v541_v7  ;;  %v551_v14 = vand.u32 2147483647, %v541_v7 }
0x1076   :  { %vm552_vm3 = vcmp.eq.f32.partialorder %v551_v14, 8.507059e+37 }
0x1078   :  { %164 = vrot.lane.b32.xlu2 %v844_v57, %s766_s7  ;;  %v554_v57 = vor.u32 1.1754944e-38, %v553_v13 }
0x107a   :  { %v711_v8 = vpop.eup %710 }
0x107b   :  { %v543_v9 = vmul.f32 %v711_v8, %v541_v7  ;;  %vm548_vm0 = vweird.f32 %v711_v8 }
0x107c   :  { %vm549_vm2 = vmor %vm547_vm1, %vm548_vm0 }
0x107d   :  { %v544_v10 = vsub.f32 1.0, %v543_v9 }
0x107f   :  { %v545_v11 = vmul.f32 %v711_v8, %v544_v10 }
0x1080   :  { %507 = vrot.lane.b32.xlu2 %v505_v63, %s768_s28 }
0x1081   :  { %v546_v12 = vadd.f32 %v711_v8, %v545_v11 }
0x1083   :  { %v550_v15 = vsel %vm549_vm2, %v711_v8, %v546_v12 }
0x1084   :  { %v555_v17 = vsel %vm552_vm3, %v554_v57, %v550_v15 }
0x1085   :  { %v558_v21 = vmul.f32 %v555_v17, %v499_v60 }
0x10ca   :  { %v561_v16 = vpop.permute.xlu2 %560 }
0x10cb   :  { %v563_v18 = vmul.f32 %v561_v16, %v555_v17 }
0x10cd   :  { %565 = vrot.lane.b32.xlu0 %v563_v18, %s767_s10 }
0x10d2   :  { %v165_v20 = vpop.permute.xlu2 %164 }
0x10d3   :  { %168 = vst.msk [vmem:[%s948_s4] sm:$0x3] %vm167_vm4, %v165_v20 }
0x10d5   :  { %438 = vrot.lane.b32.xlu0 %v889_v35, %s766_s7 }
0x10da   :  { %v508_v26 = vpop.permute.xlu2 %507 }
0x113f   :  { %v566_v22 = vpop.permute.xlu0 %565 }
0x1140   :  { %v568_v23 = vadd.f32 %v566_v22, %v558_v21 }
0x1142   :  { %712 = vtanh.f32 %v568_v23 }
0x1147   :  { %v439_v24 = vpop.permute.xlu0 %438 }
0x1148   :  { %v713_v25 = vpop.eup %712  ;;  %441 = vst.msk [vmem:[%s948_s4 + $0x2] sm:$0x3] %vm167_vm4, %v439_v24 }
0x1149   :  { %510 = vst.msk [vmem:[%s948_s4 + $0x2] sm:$0x3] %vm237_vm6, %v508_v26  ;;  %571 = vrot.lane.b32.xlu1 %v713_v25, %s766_s7 }
0x1151   :  { %234 = vrot.lane.b32.xlu1 %v855_v19, %s768_s28 }
0x1159   :  { %582 = vrot.lane.b32.xlu1 %v568_v23, %s768_s28 }
0x11bb   :  { %v572_v27 = vpop.permute.xlu1 %571 }
0x11bc   :  { %v574_v28 = vmul.f32 %v572_v27, %v555_v17 }
0x11be   :  { %575 = vst.msk [vmem:[%s948_s4 + $0x2] sm:$0x3] %vm303_vm7, %v574_v28  ;;  %577 = vrot.lane.b32.xlu0 %v574_v28, %s767_s10  ;;  %s770_s10 = smov [#allocation2]  }
0x11bf   :  { %s593_s19 = sshll.u32 %s770_s10, 4  ;;  %s594_s19 = int_to_ptr.vmem [resolvable:$true] %s593_s19 }
0x11c3   :  { %v235_v29 = vpop.permute.xlu1 %234 }
0x11c4   :  { %238 = vst.msk [vmem:[%s948_s4] sm:$0x3] %vm237_vm6, %v235_v29 }
0x11c5   :  { %304 = vst.msk [vmem:[%s948_s4] sm:$0x3] %vm303_vm7, %v866_v45 }
0x11cb   :  { %v583_v19 = vpop.permute.xlu1 %582 }
0x11cc   :  { %585 = vst.msk [vmem:[#allocation4] sm:$0x3] %vm99_vm5, %v583_v19 }
0x11cd   :  { %609 = dma.vmem_to_hbm [thread:$0]  %s605_s15, 32, %s607_s18, [#allocation5]  }
0x1230   :  { %v578_v45 = vpop.permute.xlu0 %577 }
0x1231   :  { %580 = vst.msk [vmem:[#allocation2] sm:$0x3] %vm99_vm5, %v578_v45 }
0x1232   :  { %598 = dma.vmem_to_hbm [thread:$0]  %s594_s19, 32, %s596_s22, [#allocation3]  }
0x1233   :  { %762 = dma.done.wait [#allocation3], 32  }
0x1234   :  { %763 = vsyncadd [#allocation3], 4294967264 }
0x1235   :  { %764 = dma.done.wait [#allocation5], 32  }
0x1236   :  { %765 = vsyncadd [#allocation5], 4294967264 }
0x1237   :  { %620 = vsyncpa [#allocation3], 1 }
0x1238   :  { %621 = vsyncpa [#allocation5], 1 }

</bundles_post_ra>
